<compile_context>
chip_gen: v5e
topology: v5e:2x2
jax: 0.10.0
libtpu: 0.0.40
codegen_flags: <defaults>
</compile_context>

<pallas_src>
import jax
import jax.numpy as jnp
from jax.experimental import pallas as pl
from jax.experimental.pallas import tpu as pltpu


def _add_kernel(e_ref, x_ref, o_ref):
    # Works for both paths:
    #   tiled path : e (s1_blk, LD),  x/o (s1_blk, LD)
    #   fast path  : e (S1, LD),      x/o (B, S1, LD)   (broadcast add)
    o_ref[...] = (x_ref[...] + e_ref[...]).astype(o_ref.dtype)


def _sublane_align(dtype):
    # 8 for 4-byte, 16 for 2-byte, 32 for 1-byte dtypes (packed sublanes).
    itemsize = jnp.dtype(dtype).itemsize
    return max(8, 32 // max(itemsize, 1))


def _vmem_info():
    """(per-tile budget, physical VMEM capacity) — generation-aware."""
    try:
        cap = int(pltpu.get_tpu_info().vmem_capacity_bytes)
    except Exception:
        cap = 64 << 20  # conservative (v7x-sized) fallback
    if cap >= (100 << 20):       # v5e / v6e: 128 MiB physical VMEM
        return (8 << 20), cap
    return (4 << 20), cap        # v7x: 64 MiB physical VMEM


def _pick_s1_block(s1, row_bytes, align, budget):
    """Largest sublane-aligned block whose tile fits the budget (or full S1)."""
    if s1 * row_bytes <= budget:
        return s1
    blk = (budget // row_bytes) // align * align
    blk = max(align, blk)
    return int(min(blk, s1))


def add_broadcast_pos_embed(x, emb0, emb1, *, tile_budget_bytes=None):
    """x: (B, S1, S2, D); emb0: (S1, D//2); emb1: (S2, D//2)."""
    b, s1, s2, d = x.shape
    assert d % 2 == 0, f"embd_dim {d} must be divisible by n_dim=2"
    c = d // 2
    assert emb0.shape == (s1, c) and emb1.shape == (s2, c)
    ld = s2 * d

    # Batch-invariant fused embedding, lane-dense (S1, S2*D), in x.dtype.
    embs = jnp.concatenate(
        [
            jnp.broadcast_to(emb0[:, None, :], (s1, s2, c)),  # bcast over S2
            jnp.broadcast_to(emb1[None, :, :], (s1, s2, c)),  # bcast over S1
        ],
        axis=-1,
    ).reshape(s1, ld).astype(x.dtype)

    # Lane-dense view of x: (B, S1, S2*D); free contiguous reshape.
    x2 = x.reshape(b, s1, ld)

    itemsize = jnp.dtype(x.dtype).itemsize
    row_bytes = ld * itemsize
    auto_budget, vmem_cap = _vmem_info()
    tile_budget = auto_budget if tile_budget_bytes is None else tile_budget_bytes

    # ---- Small-problem fast path: one grid step, whole batch in VMEM. ----
    total_bytes = (b + 1) * s1 * row_bytes  # x (+ out same size) + embs
    if 2 * total_bytes <= tile_budget:
        out2 = pl.pallas_call(
            _add_kernel,
            out_shape=jax.ShapeDtypeStruct((b, s1, ld), x.dtype),
            in_specs=[
                pl.BlockSpec(memory_space=pltpu.MemorySpace.VMEM),  # embs
                pl.BlockSpec(memory_space=pltpu.MemorySpace.VMEM),  # x
            ],
            out_specs=pl.BlockSpec(memory_space=pltpu.MemorySpace.VMEM),
        )(embs, x2)
        return out2.reshape(b, s1, s2, d)

    # ---- Tiled streaming path (HBM-roofline elementwise add). ----
    align = _sublane_align(x.dtype)
    s1_block = _pick_s1_block(s1, row_bytes, align, tile_budget)
    n_s1 = pl.cdiv(s1, s1_block)  # handles non-divisor S1 (boundary blocks)

    # Worst case ~6 double-buffered tiles (emb/x/out) + headroom.
    vmem_limit = int(min(6 * s1_block * row_bytes + (8 << 20),
                         vmem_cap - (4 << 20)))

    out2 = pl.pallas_call(
        _add_kernel,
        out_shape=jax.ShapeDtypeStruct((b, s1, ld), x.dtype),
        grid_spec=pltpu.PrefetchScalarGridSpec(
            num_scalar_prefetch=0,
            # Batch innermost: emb block index is constant across the inner
            # batch loop, so Pallas keeps the emb tile resident (no re-DMA).
            grid=(n_s1, b),
            in_specs=[
                # fused embedding: batch-invariant
                pl.BlockSpec((s1_block, ld), lambda si, bi: (si, 0)),
                # x tile: one batch element x one S1 slab per step
                pl.BlockSpec(
                    (pl.Squeezed(), s1_block, ld), lambda si, bi: (bi, si, 0)
                ),
            ],
            out_specs=pl.BlockSpec(
                (pl.Squeezed(), s1_block, ld), lambda si, bi: (bi, si, 0)
            ),
        ),
        compiler_params=pltpu.CompilerParams(
            # S1-block axis leads so the v7x 2-TC megacore split keeps one
            # resident emb tile per core; no-op on 1-TC v5e/v6e.
            dimension_semantics=("parallel", "parallel"),
            vmem_limit_bytes=vmem_limit,
        ),
    )(embs, x2)

    return out2.reshape(b, s1, s2, d)


def _trunc_normal(key, shape, std=0.02, dtype=jnp.float32):
    # nn.init.trunc_normal_(t, 0.0, 0.02): truncated std normal in [-2, 2] * std
    return jax.random.truncated_normal(key, -2.0, 2.0, shape, dtype) * std


def _reference(x, emb0, emb1):
    b, s1, s2, d = x.shape
    c = d // 2
    ref_embs = jnp.concatenate(
        [
            jnp.broadcast_to(emb0[None, :, None, :], (1, s1, s2, c)),
            jnp.broadcast_to(emb1[None, None, :, :], (1, s1, s2, c)),
        ],
        axis=-1,
    )
    return x + ref_embs


if __name__ == "__main__":
    key = jax.random.PRNGKey(0)

    # --- Test 1: module config shape=(16,16), embd_dim=32 -> fast path. ---
    B, S1, S2, D = 2, 16, 16, 32
    C = D // 2
    kx, k0, k1, key = jax.random.split(key, 4)
    x = jax.random.normal(kx, (B, S1, S2, D), dtype=jnp.float32)
    emb0 = _trunc_normal(k0, (S1, C))   # self.emb['d_0']
    emb1 = _trunc_normal(k1, (S2, C))   # self.emb['d_1']

    out = jax.block_until_ready(add_broadcast_pos_embed(x, emb0, emb1))
    ref = _reference(x, emb0, emb1)
    assert out.shape == x.shape and out.dtype == x.dtype
    assert jnp.allclose(out, ref, atol=1e-6, rtol=1e-6)

    # --- Test 2: force the tiled (grid) path with a tiny tile budget, ---
    # --- including a non-divisor S1 boundary block.                    ---
    B2, S1b, S2b, Db = 2, 72, 16, 32
    Cb = Db // 2
    kx2, k02, k12, key = jax.random.split(key, 4)
    x2 = jax.random.normal(kx2, (B2, S1b, S2b, Db), dtype=jnp.float32)
    e0 = _trunc_normal(k02, (S1b, Cb))
    e1 = _trunc_normal(k12, (S2b, Cb))

    out2 = jax.block_until_ready(
        add_broadcast_pos_embed(x2, e0, e1, tile_budget_bytes=32 * 1024)
    )
    ref2 = _reference(x2, e0, e1)
    assert out2.shape == x2.shape and out2.dtype == x2.dtype
    assert jnp.allclose(out2, ref2, atol=1e-6, rtol=1e-6)

    print("KERNEL_OK")
</pallas_src>

<mosaic_0001>
module attributes {stable_mosaic.version = 11 : i64} {
  func.func @_add_kernel(%arg0: memref<16x512xf32, #tpu.memory_space<vmem>>, %arg1: memref<2x16x512xf32, #tpu.memory_space<vmem>>, %arg2: memref<2x16x512xf32, #tpu.memory_space<vmem>>) attributes {dimension_semantics = [], scalar_prefetch = 0 : i64, scratch_operands = 0 : i64, tpu.core_type = #tpu.core_type<tc>} {
    %c0 = arith.constant 0 : index
    %c0_0 = arith.constant 0 : index
    %c0_1 = arith.constant 0 : index
    %0 = vector.load %arg1[%c0, %c0_0, %c0_1] : memref<2x16x512xf32, #tpu.memory_space<vmem>>, vector<2x16x512xf32>
    %c0_2 = arith.constant 0 : index
    %c0_3 = arith.constant 0 : index
    %1 = vector.load %arg0[%c0_2, %c0_3] : memref<16x512xf32, #tpu.memory_space<vmem>>, vector<16x512xf32>
    %2 = vector.shape_cast %1 : vector<16x512xf32> to vector<1x16x512xf32>
    %3 = vector.broadcast %2 : vector<1x16x512xf32> to vector<2x16x512xf32>
    %4 = arith.addf %0, %3 : vector<2x16x512xf32>
    %c0_4 = arith.constant 0 : index
    %c0_5 = arith.constant 0 : index
    %c0_6 = arith.constant 0 : index
    %5 = vector.load %arg2[%c0_4, %c0_5, %c0_6] : memref<2x16x512xf32, #tpu.memory_space<vmem>>, vector<2x16x512xf32>
    tpu.vector_store %arg2[%c0_4, %c0_5, %c0_6], %4 {strides = array<i32>} : memref<2x16x512xf32, #tpu.memory_space<vmem>>, vector<2x16x512xf32>,
    return
  }
}

</mosaic_0001>

<bundles_post_ra>
// kernel: tpu_custom_call.1
= control target key start
LH: loop header
LB: loop body
LE: loop exit
PB: predicated region body
PF: predicated region fallthrough
CT: control target
= control target key end

     0   :  { %7 = vsyncpa [#allocation3], 0  ;;  %s241_s0 = inlined_call_operand.hbm [shape: f32[16,512], index: 0, kind: input, shape index: {}]   ;;  %s242_s1 = inlined_call_operand.hbm [shape: f32[2,16,512], index: 1, kind: input, shape index: {}]   ;;  %s243_s2 = inlined_call_operand.hbm [shape: f32[2,16,512], index: 2, kind: output, shape index: {}]  }
   0x1   :  { %8 = vsyncpa [#allocation6], 0 }
   0x2   :  { %9 = vsyncpa [#allocation4], 0  ;;  %s14_s11 = sshll.u32 %s241_s0, 4  ;;  %s203_s12 = smov [#allocation2]   ;;  %s15_s11 = int_to_ptr.hbm [resolvable:$true] %s14_s11 }
   0x3   :  { %s16_s13 = sshll.u32 %s203_s12, 4  ;;  %s27_s16 = sshll.u32 %s242_s1, 4  ;;  %s17_s13 = int_to_ptr.vmem [resolvable:$true] %s16_s13  ;;  %s28_s16 = int_to_ptr.hbm [resolvable:$true] %s27_s16 }
   0x4   :  { %s204_s17 = smov 512   ;;  %s205_s18 = smov 32  }
   0x5   :  { %22 = dma.hbm_to_vmem [thread:$0]  %s15_s11, 1024, %s17_s13, [#allocation3], %s204_s17, %s204_s17, %s205_s18  }
   0x6   :  { %s206_s19 = smov [#allocation5]  }
   0x7   :  { %s29_s20 = sshll.u32 %s206_s19, 4  ;;  %s30_s20 = int_to_ptr.vmem [resolvable:$true] %s29_s20 }
   0x8   :  { %35 = dma.hbm_to_vmem [thread:$0]  %s28_s16, 2048, %s30_s20, [#allocation6], %s204_s17, %s204_s17, %s205_s18  }
   0x9   :  { %197 = dma.done.wait [#allocation3], 1024  }
   0xa   :  { %198 = vsyncadd [#allocation3], 4294966272 }
   0xb   :  { %199 = dma.done.wait [#allocation6], 2048  }
   0xc   :  { %200 = vsyncadd [#allocation6], 4294965248  ;;  %v44_v0 = vld [vmem:[#allocation5] sm:$0xff]  ;;  %v45_v2 = vld [vmem:[#allocation5 + $0x8] sm:$0xff]  ;;  %s207_s0 = smov [#allocation7]   ;;  %s106_s23 = sshll.u32 %s243_s2, 4  ;;  %s107_s23 = int_to_ptr.hbm [resolvable:$true] %s106_s23 }
   0xd   :  { %v60_v1 = vld [vmem:[#allocation2] sm:$0xff]  ;;  %v61_v4 = vld [vmem:[#allocation2 + $0x8] sm:$0xff]  ;;  %v46_v5 = vld [vmem:[#allocation5 + $0x10] sm:$0xff]  ;;  %s104_s1 = sshll.u32 %s207_s0, 4  ;;  %s105_s1 = int_to_ptr.vmem [resolvable:$true] %s104_s1 }
   0xe   :  { %v68_v3 = vadd.f32 %v60_v1, %v44_v0  ;;  %v62_v6 = vld [vmem:[#allocation2 + $0x10] sm:$0xff]  ;;  %v69_v7 = vadd.f32 %v61_v4, %v45_v2  ;;  %v47_v9 = vld [vmem:[#allocation5 + $0x18] sm:$0xff]  ;;  %v48_v11 = vld [vmem:[#allocation5 + $0x20] sm:$0xff] }
   0xf   :  { %v70_v8 = vadd.f32 %v62_v6, %v46_v5  ;;  %v63_v10 = vld [vmem:[#allocation2 + $0x18] sm:$0xff]  ;;  %v64_v13 = vld [vmem:[#allocation2 + $0x20] sm:$0xff]  ;;  %v49_v14 = vld [vmem:[#allocation5 + $0x28] sm:$0xff] }
  0x10   :  { %84 = vst [vmem:[#allocation7] sm:$0xff] %v68_v3  ;;  %v71_v12 = vadd.f32 %v63_v10, %v47_v9  ;;  %v65_v15 = vld [vmem:[#allocation2 + $0x28] sm:$0xff]  ;;  %v72_v16 = vadd.f32 %v64_v13, %v48_v11  ;;  %v50_v18 = vld [vmem:[#allocation5 + $0x30] sm:$0xff]  ;;  %v51_v20 = vld [vmem:[#allocation5 + $0x38] sm:$0xff] }
  0x11   :  { %85 = vst [vmem:[#allocation7 + $0x8] sm:$0xff] %v69_v7  ;;  %v73_v17 = vadd.f32 %v65_v15, %v49_v14  ;;  %v66_v19 = vld [vmem:[#allocation2 + $0x30] sm:$0xff]  ;;  %v67_v22 = vld [vmem:[#allocation2 + $0x38] sm:$0xff]  ;;  %v52_v23 = vld [vmem:[#allocation5 + $0x40] sm:$0xff] }
  0x12   :  { %86 = vst [vmem:[#allocation7 + $0x10] sm:$0xff] %v70_v8  ;;  %v74_v21 = vadd.f32 %v66_v19, %v50_v18  ;;  %v53_v24 = vld [vmem:[#allocation5 + $0x48] sm:$0xff]  ;;  %v75_v25 = vadd.f32 %v67_v22, %v51_v20  ;;  %v54_v26 = vld [vmem:[#allocation5 + $0x50] sm:$0xff]  ;;  %v76_v27 = vadd.f32 %v60_v1, %v52_v23  ;;  %v55_v28 = vld [vmem:[#allocation5 + $0x58] sm:$0xff] }
  0x13   :  { %87 = vst [vmem:[#allocation7 + $0x18] sm:$0xff] %v71_v12  ;;  %v77_v29 = vadd.f32 %v61_v4, %v53_v24  ;;  %v56_v30 = vld [vmem:[#allocation5 + $0x60] sm:$0xff]  ;;  %v78_v31 = vadd.f32 %v62_v6, %v54_v26  ;;  %v57_v32 = vld [vmem:[#allocation5 + $0x68] sm:$0xff]  ;;  %v79_v33 = vadd.f32 %v63_v10, %v55_v28  ;;  %v58_v34 = vld [vmem:[#allocation5 + $0x70] sm:$0xff] }
  0x14   :  { %88 = vst [vmem:[#allocation7 + $0x20] sm:$0xff] %v72_v16  ;;  %v80_v35 = vadd.f32 %v64_v13, %v56_v30  ;;  %v59_v36 = vld [vmem:[#allocation5 + $0x78] sm:$0xff]  ;;  %v81_v37 = vadd.f32 %v65_v15, %v57_v32  ;;  %v82_v38 = vadd.f32 %v66_v19, %v58_v34 }
  0x15   :  { %89 = vst [vmem:[#allocation7 + $0x28] sm:$0xff] %v73_v17  ;;  %v83_v39 = vadd.f32 %v67_v22, %v59_v36 }
  0x16   :  { %90 = vst [vmem:[#allocation7 + $0x30] sm:$0xff] %v74_v21 }
  0x17   :  { %91 = vst [vmem:[#allocation7 + $0x38] sm:$0xff] %v75_v25 }
  0x18   :  { %92 = vst [vmem:[#allocation7 + $0x40] sm:$0xff] %v76_v27 }
  0x19   :  { %93 = vst [vmem:[#allocation7 + $0x48] sm:$0xff] %v77_v29 }
  0x1a   :  { %94 = vst [vmem:[#allocation7 + $0x50] sm:$0xff] %v78_v31 }
  0x1b   :  { %95 = vst [vmem:[#allocation7 + $0x58] sm:$0xff] %v79_v33 }
  0x1c   :  { %96 = vst [vmem:[#allocation7 + $0x60] sm:$0xff] %v80_v35 }
  0x1d   :  { %97 = vst [vmem:[#allocation7 + $0x68] sm:$0xff] %v81_v37 }
  0x1e   :  { %98 = vst [vmem:[#allocation7 + $0x70] sm:$0xff] %v82_v38 }
  0x1f   :  { %99 = vst [vmem:[#allocation7 + $0x78] sm:$0xff] %v83_v39 }
  0x20   :  { %112 = dma.vmem_to_hbm [thread:$0]  %s105_s1, 2048, %s107_s23, [#allocation4], %s204_s17, %s204_s17, %s205_s18  }
  0x21   :  { %201 = dma.done.wait [#allocation4], 2048  }
  0x22   :  { %202 = vsyncadd [#allocation4], 4294965248 }
  0x23   :  { %117 = vsyncpa [#allocation3], 1 }
  0x24   :  { %118 = vsyncpa [#allocation6], 1 }
  0x25   :  { %119 = vsyncpa [#allocation4], 1 }

</bundles_post_ra>
